<compile_context>
chip_gen: v5e
topology: v5e:2x2
jax: 0.10.0
libtpu: 0.0.40
codegen_flags: <defaults>
</compile_context>

<pallas_src>
import functools

import jax
import jax.numpy as jnp
from jax.experimental import pallas as pl
from jax.experimental.pallas import tpu as pltpu

_LANE = 128
# Target bytes for one input tile (per stream, per buffer). 2 MiB ->
# 4096 rows x 128 lanes for f32, 8192 rows for bf16. With 5 streams x 2
# buffers this is ~20 MiB of VMEM, which we make legal everywhere by setting
# vmem_limit_bytes explicitly (v5e's scoped default is only 16 MiB).
_TARGET_TILE_BYTES = 2 * 1024 * 1024
_VMEM_LIMIT_BYTES = 32 * 1024 * 1024


def _fd4_kernel(p2_ref, p1_ref, m1_ref, m2_ref, o_ref, *, coef):
    # coef = 1/(12*dx), baked in at trace time.
    p2 = p2_ref[...].astype(jnp.float32)
    p1 = p1_ref[...].astype(jnp.float32)
    m1 = m1_ref[...].astype(jnp.float32)
    m2 = m2_ref[...].astype(jnp.float32)
    # Factored form: one scalar broadcast, 2 subs + 1 mul + 1 add + 1 mul.
    out = coef * (8.0 * (p1 - m1) + (m2 - p2))
    o_ref[...] = out.astype(o_ref.dtype)


def _fd4_jnp(p2, p1, m1, m2, coef, dtype):
    """Plain-jnp stencil for the (rare) <128-element ragged tail."""
    out = coef * (8.0 * (p1.astype(jnp.float32) - m1.astype(jnp.float32))
                  + (m2.astype(jnp.float32) - p2.astype(jnp.float32)))
    return out.astype(dtype)


def _choose_tile_rows(rows: int, itemsize: int) -> int:
    """Byte-aware tile selection with a >=2-block split for megacore."""
    max_rows = max(8, (_TARGET_TILE_BYTES // (_LANE * itemsize)) // 8 * 8)
    if rows > max_rows:
        return max_rows
    # Field fits in a single tile: split into two balanced, 8-row-aligned
    # blocks so the "parallel" axis can shard across both v7x TensorCores.
    half = ((pl.cdiv(rows, 2) + 7) // 8) * 8
    if half >= rows:
        # Too small to split on a sublane boundary; full-extent block is
        # always layout-legal.
        return rows
    return half


def first_deriv_fourth_order(u_p2, u_p1, u_m1, u_m2, dx):
    """4th-order central first derivative, computed in a Pallas TPU kernel.

    dx must be a static Python float (module contract); it is folded into a
    trace-time constant.
    """
    orig_shape = u_p2.shape
    dtype = u_p2.dtype
    total = u_p2.size
    itemsize = jnp.dtype(dtype).itemsize

    coef = 1.0 / (12.0 * float(dx))

    # 128-aligned prefix goes through Pallas; the <128-element tail (rare for
    # NCHW fields) is computed with plain jnp — no jnp.pad full copies.
    tail = total % _LANE
    main = total - tail

    flats = [a.reshape(-1) for a in (u_p2, u_p1, u_m1, u_m2)]

    pieces = []
    if main:
        rows = main // _LANE
        tile_r = _choose_tile_rows(rows, itemsize)
        grid = (pl.cdiv(rows, tile_r),)
        block = pl.BlockSpec((tile_r, _LANE), lambda i: (i, 0))

        cost = pl.CostEstimate(
            flops=5 * main,               # 2 sub + 1 mul + 1 add + 1 mul / elem
            transcendentals=0,
            bytes_accessed=5 * main * itemsize,   # 4 reads + 1 write
        )

        out_main = pl.pallas_call(
            functools.partial(_fd4_kernel, coef=coef),
            out_shape=jax.ShapeDtypeStruct((rows, _LANE), dtype),
            grid=grid,
            in_specs=[block, block, block, block],
            out_specs=block,
            compiler_params=pltpu.CompilerParams(
                # Single independent axis: megacore-shardable on v7x.
                dimension_semantics=("parallel",),
                # Explicit limit so the 2 MiB tiles are legal on v5e's 16 MiB
                # scoped default too, and consistent across generations.
                vmem_limit_bytes=_VMEM_LIMIT_BYTES,
            ),
            cost_estimate=cost,
        )(*(f[:main].reshape(rows, _LANE) for f in flats))
        pieces.append(out_main.reshape(-1))

    if tail:
        p2t, p1t, m1t, m2t = (f[main:] for f in flats)
        pieces.append(_fd4_jnp(p2t, p1t, m1t, m2t, coef, dtype))

    flat = pieces[0] if len(pieces) == 1 else jnp.concatenate(pieces)
    return flat.reshape(orig_shape)


class FirstDerivFourthOrder:
    """JAX/Pallas port of the PyTorch module (dict-in / dict-out semantics)."""

    def __init__(self, var: str, indep_var: str, out_name: str) -> None:
        self.var = var
        self.indep_var = indep_var
        self.out_name = out_name

    def __call__(self, inputs, dx):
        p2 = inputs[f"{self.var}>>{self.indep_var}::2"]
        p1 = inputs[f"{self.var}>>{self.indep_var}::1"]
        m1 = inputs[f"{self.var}>>{self.indep_var}::-1"]
        m2 = inputs[f"{self.var}>>{self.indep_var}::-2"]
        return {self.out_name: first_deriv_fourth_order(p2, p1, m1, m2, dx)}


def _ref(inputs, var, indep_var, dx):
    """Pure-JAX reference of the exact PyTorch forward semantics."""
    return (-1.0 / (dx * 12.0) * inputs[f"{var}>>{indep_var}::2"]
            + 8.0 / (dx * 12.0) * inputs[f"{var}>>{indep_var}::1"]
            + -8.0 / (dx * 12.0) * inputs[f"{var}>>{indep_var}::-1"]
            + 1.0 / (dx * 12.0) * inputs[f"{var}>>{indep_var}::-2"])


if __name__ == "__main__":
    key = jax.random.PRNGKey(0)
    dx = 0.1
    mod = FirstDerivFourthOrder(var="u", indep_var="x", out_name="u__x")

    # --- Case 1: NCHW field, lane-aligned total (typical path) -------------
    N, C, H, W = 2, 4, 16, 16
    x = jax.random.normal(key, (N, C, H, W), dtype=jnp.float32)
    inputs = {
        "u>>x::2":  jnp.roll(x, -2, axis=-1),
        "u>>x::1":  jnp.roll(x, -1, axis=-1),
        "u>>x::-1": jnp.roll(x, 1, axis=-1),
        "u>>x::-2": jnp.roll(x, 2, axis=-1),
    }
    out = mod(inputs, dx)["u__x"]
    jax.block_until_ready(out)
    ref = _ref(inputs, "u", "x", dx)
    assert out.shape == (N, C, H, W) and out.dtype == jnp.float32
    assert jnp.allclose(out, ref, rtol=1e-5, atol=1e-5)

    # --- Case 2: ragged total (exercises the Pallas-prefix + jnp-tail path) -
    key2 = jax.random.PRNGKey(1)
    y = jax.random.normal(key2, (3, 5, 27), dtype=jnp.float32)   # 405 elements
    inputs2 = {
        "u>>x::2":  jnp.roll(y, -2, axis=-1),
        "u>>x::1":  jnp.roll(y, -1, axis=-1),
        "u>>x::-1": jnp.roll(y, 1, axis=-1),
        "u>>x::-2": jnp.roll(y, 2, axis=-1),
    }
    out2 = mod(inputs2, dx)["u__x"]
    jax.block_until_ready(out2)
    ref2 = _ref(inputs2, "u", "x", dx)
    assert out2.shape == y.shape and out2.dtype == jnp.float32
    assert jnp.allclose(out2, ref2, rtol=1e-5, atol=1e-5)

    print("KERNEL_OK")
</pallas_src>

<mosaic_0001>
module attributes {stable_mosaic.version = 11 : i64} {
  func.func @_fd4_kernel(%arg0: i32, %arg1: memref<8x128xf32, #tpu.memory_space<vmem>>, %arg2: memref<8x128xf32, #tpu.memory_space<vmem>>, %arg3: memref<8x128xf32, #tpu.memory_space<vmem>>, %arg4: memref<8x128xf32, #tpu.memory_space<vmem>>, %arg5: memref<8x128xf32, #tpu.memory_space<vmem>>) attributes {dimension_semantics = [#tpu.dimension_semantics<parallel>], iteration_bounds = array<i64: 2>, scalar_prefetch = 0 : i64, scratch_operands = 0 : i64, tpu.core_type = #tpu.core_type<tc>, window_params = [{transform_indices = @transform_0, window_bounds = array<i64: 8, 128>}, {transform_indices = @transform_1, window_bounds = array<i64: 8, 128>}, {transform_indices = @transform_2, window_bounds = array<i64: 8, 128>}, {transform_indices = @transform_3, window_bounds = array<i64: 8, 128>}, {transform_indices = @transform_4, window_bounds = array<i64: 8, 128>}]} {
    %c0 = arith.constant 0 : index
    %c0_0 = arith.constant 0 : index
    %0 = vector.load %arg1[%c0, %c0_0] : memref<8x128xf32, #tpu.memory_space<vmem>>, vector<8x128xf32>
    %c0_1 = arith.constant 0 : index
    %c0_2 = arith.constant 0 : index
    %1 = vector.load %arg2[%c0_1, %c0_2] : memref<8x128xf32, #tpu.memory_space<vmem>>, vector<8x128xf32>
    %c0_3 = arith.constant 0 : index
    %c0_4 = arith.constant 0 : index
    %2 = vector.load %arg3[%c0_3, %c0_4] : memref<8x128xf32, #tpu.memory_space<vmem>>, vector<8x128xf32>
    %c0_5 = arith.constant 0 : index
    %c0_6 = arith.constant 0 : index
    %3 = vector.load %arg4[%c0_5, %c0_6] : memref<8x128xf32, #tpu.memory_space<vmem>>, vector<8x128xf32>
    %4 = arith.subf %1, %2 : vector<8x128xf32>
    %cst = arith.constant 8.000000e+00 : f32
    %5 = vector.broadcast %cst : f32 to vector<8x128xf32>
    %6 = arith.mulf %5, %4 : vector<8x128xf32>
    %7 = arith.subf %3, %0 : vector<8x128xf32>
    %8 = arith.addf %6, %7 : vector<8x128xf32>
    %cst_7 = arith.constant 0.833333313 : f32
    %9 = vector.broadcast %cst_7 : f32 to vector<8x128xf32>
    %10 = arith.mulf %9, %8 : vector<8x128xf32>
    %c0_8 = arith.constant 0 : index
    %c0_9 = arith.constant 0 : index
    %11 = vector.load %arg5[%c0_8, %c0_9] : memref<8x128xf32, #tpu.memory_space<vmem>>, vector<8x128xf32>
    tpu.vector_store %arg5[%c0_8, %c0_9], %10 {strides = array<i32>} : memref<8x128xf32, #tpu.memory_space<vmem>>, vector<8x128xf32>,
    return
  }
  func.func @transform_0(%arg0: i32) -> (i32, i32) {
    %c0_i32 = arith.constant 0 : i32
    %c0_i32_0 = arith.constant 0 : i32
    return %arg0, %c0_i32 : i32, i32
  }
  func.func @transform_1(%arg0: i32) -> (i32, i32) {
    %c0_i32 = arith.constant 0 : i32
    %c0_i32_0 = arith.constant 0 : i32
    return %arg0, %c0_i32 : i32, i32
  }
  func.func @transform_2(%arg0: i32) -> (i32, i32) {
    %c0_i32 = arith.constant 0 : i32
    %c0_i32_0 = arith.constant 0 : i32
    return %arg0, %c0_i32 : i32, i32
  }
  func.func @transform_3(%arg0: i32) -> (i32, i32) {
    %c0_i32 = arith.constant 0 : i32
    %c0_i32_0 = arith.constant 0 : i32
    return %arg0, %c0_i32 : i32, i32
  }
  func.func @transform_4(%arg0: i32) -> (i32, i32) {
    %c0_i32 = arith.constant 0 : i32
    %c0_i32_0 = arith.constant 0 : i32
    return %arg0, %c0_i32 : i32, i32
  }
}

</mosaic_0001>

<bundles_post_ra>
// kernel: tpu_custom_call.1
= control target key start
LH: loop header
LB: loop body
LE: loop exit
PB: predicated region body
PF: predicated region fallthrough
CT: control target
= control target key end

     0   :  { %s1003_s0 = inlined_call_operand.hbm [shape: f32[16,128], index: 0, kind: input, shape index: {}]   ;;  %s1004_s1 = inlined_call_operand.hbm [shape: f32[16,128], index: 1, kind: input, shape index: {}]   ;;  %s1005_s2 = inlined_call_operand.hbm [shape: f32[16,128], index: 2, kind: input, shape index: {}]   ;;  %s1006_s3 = inlined_call_operand.hbm [shape: f32[16,128], index: 3, kind: input, shape index: {}]   ;;  %s1007_s4 = inlined_call_operand.hbm [shape: f32[16,128], index: 4, kind: output, shape index: {}]  }
   0x1   :  { %1011 = sst [smem:[#allocation18_spill]] %s1004_s1 }
   0x2   :  { %9 = vsyncpa [#allocation3], 0 }
   0x3   :  { %11 = vsyncpa [#allocation3 + $0x1], 0 }
   0x4   :  { %12 = vsyncpa [#allocation6], 0 }
   0x5   :  { %14 = vsyncpa [#allocation6 + $0x1], 0 }
   0x6   :  { %15 = vsyncpa [#allocation9], 0 }
   0x7   :  { %17 = vsyncpa [#allocation9 + $0x1], 0 }
   0x8   :  { %18 = vsyncpa [#allocation4], 0 }
   0x9   :  { %20 = vsyncpa [#allocation4 + $0x1], 0  ;;  %s794_s15 = smov 0   ;;  %s796_s16 = smov 0  }
   0xa   :  { %s798_s17 = smov 0   ;;  %s800_s18 = smov 0  }
   0xb LB: > { %1012 = sst [smem:[#allocation15_spill]] %s763_s17  ;;  %s815_s19 = sadd.s32 4294967295, %s767_s18   ;;  %s767_s18 = sphi %s800_s18, %s1021_s18   ;;  %s763_s17 = sphi %s798_s17, %s1023_s17   ;;  %s759_s16 = sphi %s796_s16, %s1025_s16   ;;  %s755_s15 = sphi %s794_s15, %s1024_s15  }
   0xc   : > { %s491_s20 = sadd.s32 4294967294, %s767_s18   ;;  %s819_s21 = sadd.s32 1, %s767_s18  }
   0xd   : > { %1013 = sst [smem:[#allocation16_spill]] %s819_s21  ;;  %s33_s22 = sadd.s32 1, %s763_s17 }
   0xe   : > { %s30_s23 = ssub.s32 %s767_s18, %s819_s21  ;;  %p40_p0 = scmp.ne.s32.totalorder %s763_s17, %s759_s16 }
   0xf   : > { %p31_p1 = scmp.eq.s32.totalorder %s30_s23, 0  ;;  %p41_p2 = scmp.eq.s32.totalorder %s767_s18, 0 }
  0x10   : > { %p46_p3 = scmp.ne.s32.totalorder %s759_s16, %s755_s15  ;;  %p47_p4 = scmp.eq.s32.totalorder %s815_s19, 0 }
  0x11   : > { %s831_s24 = scalar_select %p31_p1, %s763_s17, %s33_s22  }
  0x12   : > { %p42_p5 = por %p41_p2, %p40_p0  ;;  %p833_p6 = por %p47_p4, %p46_p3 }
  0x13   : > { %1014 = sst [smem:[#allocation17_spill]] %s831_s24  ;;  %p148_p7 = scmp.eq.s32.totalorder %s815_s19, 1 }
  0x14   : > { %p154_p8 = scmp.eq.s32.totalorder %s491_s20, 1  ;;  %p493_p9 = scmp.ge.s32.totalorder %s767_s18, 2 }
  0x15   : > { %p539_p10 = scmp.lt.s32.totalorder %s767_s18, 2  ;;  %p840_p11 = por %p148_p7, %p40_p0 }
  0x16   : > { %p844_p12 = por %p154_p8, %p46_p3  ;;  %s849_s28 = sand.u32 1, %s763_s17  }
  0x17   : > { %s852_s29 = sshll.u32 %s767_s18, 3  ;;  %s855_s30 = sshll.u32 %s849_s28, 3 }
  0x18   : > { %p857_p13 = pnand %p539_p10, %p42_p5  ;;  %s193_s6 = sand.u32 1, %s767_s18  }
  0x19   : > { %s1019_s1 = sld [smem:[#allocation18_spill]]  ;;  %s197_s10 = scalar_lea.vmem [#allocation5], %s855_s30 }
  0x1a   : > { %s205_s11 = sshll.u32 %s197_s10, 4  ;;  %p502_p0 = scmp.ge.s32.totalorder %s767_s18, 1  ;;  %s206_s11 = int_to_ptr.vmem [resolvable:$true] %s205_s11 }
  0x1b   : > { %s868_s13 = scalar_lea.sflag [#allocation6], %s193_s6  ;;  %p577_p2 = pneg %p857_p13 }
  0x1f   : > { %s201_s9 = scalar_lea.hbm %s1019_s1, %s852_s29  ;;  %s580_s7 = scalar_lea.hbm %s1019_s1, 16 }
  0x20   : > { %s203_s12 = sshll.u32 %s201_s9, 4  ;;  %s204_s12 = int_to_ptr.hbm [resolvable:$true] %s203_s12 }
  0x21   : > { %s573_s14 = sshra.s32 %s204_s12, 4  ;;  %s574_s14 = int_to_ptr.hbm [resolvable:$true] %s573_s14 }
  0x22   : > { %s575_s20 = scalar_lea.hbm %s574_s14, 8  ;;  %p581_p5 = scmp.lt.s32.totalorder %s574_s14, %s1019_s1 }
  0x23   : > { %p576_p1 = scmp.ne.s32.totalorder %s574_s14, %s575_s20  ;;  %p582_p7 = scmp.lt.s32.totalorder %s580_s7, %s575_s20 }
  0x25   : > { %p578_p3 = pnand %p577_p2, %p576_p1  ;;  %p583_p8 = por %p582_p7, %p581_p5 }
  0x27   : > { %p579_p4 = pneg %p578_p3 }
  0x29   : > { %p584_p10 = pnand %p583_p8, %p579_p4 }
  0x2b   : > { %587 = shalt.err (!%p584_p10)
}
  0x2c   : > { %528 = dma.hbm_to_vmem [thread:$0]  (!%p857_p13), %s204_s12, 128, %s206_s11, %s868_s13  }
  0x2d   : > { %p248_p1 = scmp.lt.s32.totalorder %s767_s18, 3  ;;  %s182_s22 = scalar_lea.hbm %s1003_s0, %s852_s29 }
  0x2e   : > { %s184_s20 = sshll.u32 %s182_s22, 4  ;;  %s178_s23 = scalar_lea.vmem [#allocation2], %s855_s30  ;;  %s185_s20 = int_to_ptr.hbm [resolvable:$true] %s184_s20 }
  0x2f   : > { %p891_p3 = pnand %p502_p0, %p248_p1  ;;  %s186_s7 = sshll.u32 %s178_s23, 4  ;;  %s187_s7 = int_to_ptr.vmem [resolvable:$true] %s186_s7 }
  0x30   : > { %s175_s8 = scalar_lea.sflag [#allocation3], %s849_s28  ;;  %s603_s9 = sshra.s32 %s185_s20, 4  ;;  %s604_s9 = int_to_ptr.hbm [resolvable:$true] %s603_s9 }
  0x31   : > { %s605_s1 = scalar_lea.hbm %s604_s9, 8  ;;  %s610_s6 = scalar_lea.hbm %s1003_s0, 16 }
  0x32   : > { %p606_p4 = scmp.ne.s32.totalorder %s604_s9, %s605_s1  ;;  %p611_p0 = scmp.lt.s32.totalorder %s604_s9, %s1003_s0 }
  0x33   : > { %p612_p8 = scmp.lt.s32.totalorder %s610_s6, %s605_s1 }
  0x34   : > { %p608_p5 = pnand %p606_p4, %p577_p2 }
  0x35   : > { %p613_p10 = por %p612_p8, %p611_p0 }
  0x36   : > { %p609_p7 = pneg %p608_p5 }
  0x38   : > { %p614_p1 = pnand %p613_p10, %p609_p7 }
  0x3a   : > { %617 = shalt.err (!%p614_p1)
}
  0x3b   : > { %525 = dma.hbm_to_vmem [thread:$0]  (!%p857_p13), %s185_s20, 128, %s187_s7, %s175_s8  }
  0x3c   : > { %s220_s17 = scalar_lea.hbm %s1005_s2, %s852_s29  ;;  %s216_s11 = scalar_lea.vmem [#allocation7], %s855_s30 }
  0x3d   : > { %s224_s12 = sshll.u32 %s216_s11, 4  ;;  %s222_s21 = sshll.u32 %s220_s17, 4  ;;  %s225_s12 = int_to_ptr.vmem [resolvable:$true] %s224_s12  ;;  %s223_s21 = int_to_ptr.hbm [resolvable:$true] %s222_s21 }
  0x3e   : > { %s633_s24 = sshra.s32 %s223_s21, 4  ;;  %s640_s20 = scalar_lea.hbm %s1005_s2, 16  ;;  %s634_s24 = int_to_ptr.hbm [resolvable:$true] %s633_s24 }
  0x3f   : > { %s635_s1 = scalar_lea.hbm %s634_s24, 8  ;;  %p641_p0 = scmp.lt.s32.totalorder %s634_s24, %s1005_s2 }
  0x40   : > { %p636_p4 = scmp.ne.s32.totalorder %s634_s24, %s635_s1  ;;  %p642_p8 = scmp.lt.s32.totalorder %s640_s20, %s635_s1 }
  0x42   : > { %p638_p5 = pnand %p636_p4, %p577_p2  ;;  %p643_p10 = por %p642_p8, %p641_p0 }
  0x44   : > { %p639_p7 = pneg %p638_p5 }
  0x46   : > { %p644_p1 = pnand %p643_p10, %p639_p7 }
  0x48   : > { %647 = shalt.err (!%p644_p1)
}
  0x49   : > { %531 = dma.hbm_to_vmem [thread:$0]  (!%p857_p13), %s223_s21, 128, %s225_s12, %s868_s13  }
  0x4a   : > { %s239_s22 = scalar_lea.hbm %s1006_s3, %s852_s29  ;;  %s235_s11 = scalar_lea.vmem [#allocation8], %s855_s30 }
  0x4b   : > { %s241_s23 = sshll.u32 %s239_s22, 4  ;;  %s243_s9 = sshll.u32 %s235_s11, 4  ;;  %s242_s23 = int_to_ptr.hbm [resolvable:$true] %s241_s23  ;;  %s244_s9 = int_to_ptr.vmem [resolvable:$true] %s243_s9 }
  0x4c   : > { %s232_s24 = scalar_lea.sflag [#allocation9], %s849_s28  ;;  %s663_s1 = sshra.s32 %s242_s23, 4  ;;  %s664_s1 = int_to_ptr.hbm [resolvable:$true] %s663_s1 }
  0x4d   : > { %s665_s6 = scalar_lea.hbm %s664_s1, 8  ;;  %s670_s13 = scalar_lea.hbm %s1006_s3, 16 }
  0x4e   : > { %p666_p4 = scmp.ne.s32.totalorder %s664_s1, %s665_s6  ;;  %p671_p0 = scmp.lt.s32.totalorder %s664_s1, %s1006_s3 }
  0x4f   : > { %p672_p8 = scmp.lt.s32.totalorder %s670_s13, %s665_s6 }
  0x50   : > { %p668_p5 = pnand %p666_p4, %p577_p2 }
  0x51   : > { %p673_p10 = por %p672_p8, %p671_p0 }
  0x52   : > { %p669_p7 = pneg %p668_p5 }
  0x54   : > { %p674_p1 = pnand %p673_p10, %p669_p7 }
  0x56   : > { %677 = shalt.err (!%p674_p1)
}
  0x57   : > { %534 = dma.hbm_to_vmem [thread:$0]  (!%p857_p13), %s242_s23, 128, %s244_s9, %s232_s24  }
  0x58   : > { %252 = sbr.rel (%p891_p3) target bundleno = 115 (0x73), region = 36  ;;  %s945_s28 = sand.u32 (!%p891_p3), 1, %s759_s16  }
  0x59   : > { %s948_s30 = sshll.u32 (!%p891_p3), %s945_s28, 3  ;;  %s255_s7 = scalar_lea.sflag (!%p891_p3), [#allocation3], %s945_s28 }
  0x5a   : > { %s258_s8 = scalar_lea.vmem (!%p891_p3), [#allocation2], %s948_s30 }
  0x5d   : > { %738 = dma.done.wait (%p833_p6), %s255_s7, 128  }
  0x5e   : > { %740 = vsyncadd (%p833_p6), %s255_s7, 4294967168  ;;  %s264_s5 = sand.u32 1, %s815_s19   ;;  %s268_s17 = scalar_lea.vmem [#allocation5], %s948_s30 }
  0x5f   : > { %s265_s14 = scalar_lea.sflag [#allocation6], %s264_s5 }
  0x60   : > { %742 = dma.done.wait (%p833_p6), %s265_s14, 256  }
  0x61   : > { %744 = vsyncadd (%p833_p6), %s265_s14, 4294967040  ;;  %s278_s10 = scalar_lea.vmem [#allocation7], %s948_s30  ;;  %s285_s22 = scalar_lea.sflag [#allocation9], %s945_s28 }
  0x62   : > { %s288_s23 = scalar_lea.vmem [#allocation8], %s948_s30 }
  0x63   : > { %746 = dma.done.wait (%p833_p6), %s285_s22, 128  }
  0x64   : > { %748 = vsyncadd (%p833_p6), %s285_s22, 4294967168  ;;  %s509_s11 = sshll.u32 %s815_s19, 3  ;;  %v329_v0 = vld [vmem:[%s258_s8] sm:$0xff]  ;;  %v330_v1 = vld [vmem:[%s268_s17] sm:$0xff]  ;;  %s328_s6 = scalar_lea.vmem [#allocation10], %s948_s30 }
  0x65   : > { %v331_v2 = vld [vmem:[%s278_s10] sm:$0xff]  ;;  %v332_v3 = vld [vmem:[%s288_s23] sm:$0xff]  ;;  %s350_s1 = scalar_lea.hbm %s1007_s4, %s509_s11  ;;  %s352_s20 = sshll.u32 %s328_s6, 4  ;;  %s353_s20 = int_to_ptr.vmem [resolvable:$true] %s352_s20 }
  0x66   : > { %v333_v4 = vsub.f32 %v330_v1, %v331_v2  ;;  %v335_v5 = vsub.f32 %v332_v3, %v329_v0  ;;  %s354_s25 = sshll.u32 %s350_s1, 4  ;;  %s340_s19 = scalar_lea.sflag [#allocation4], %s945_s28  ;;  %s355_s25 = int_to_ptr.hbm [resolvable:$true] %s354_s25 }
  0x67   : > { %s707_s21 = sshra.s32 %s355_s25, 4  ;;  %s713_s7 = scalar_lea.hbm %s1007_s4, 16  ;;  %s708_s21 = int_to_ptr.hbm [resolvable:$true] %s707_s21 }
  0x68   : > { %v334_v6 = vmul.f32 8.0, %v333_v4  ;;  %s709_s13 = scalar_lea.hbm %s708_s21, 8  ;;  %p714_p3 = scmp.lt.s32.totalorder %s708_s21, %s1007_s4 }
  0x69   : > { %p710_p6 = scmp.ne.s32.totalorder %s708_s21, %s709_s13  ;;  %p715_p4 = scmp.lt.s32.totalorder %s713_s7, %s709_s13 }
  0x6a   : > { %v336_v7 = vadd.f32 %v335_v5, %v334_v6 }
  0x6b   : > { %p711_p13 = pnand %p710_p6, %p840_p11  ;;  %p716_p5 = por %p715_p4, %p714_p3 }
  0x6c   : > { %v337_v8 = vmul.f32 0.8333333, %v336_v7 }
  0x6d   : > { %p712_p2 = pneg %p711_p13 }
  0x6e   : > { %338 = vst [vmem:[%s328_s6] sm:$0xff] %v337_v8 }
  0x6f   : > { %p717_p7 = pnand %p716_p5, %p712_p2 }
  0x71   : > { %720 = shalt.err (!%p717_p7)
}
  0x72   : > { %520 = dma.vmem_to_hbm [thread:$0]  (%p840_p11), %s353_s20, 128, %s355_s25, %s340_s19  }
  0x73 PF: > { %s366_s28 = sand.u32 1, %s755_s15   ;;  %p536_p0 = pnand %p493_p9, %p844_p12 }
  0x74   : > { %s367_s5 = scalar_lea.sflag [#allocation4], %s366_s28 }
  0x75   : > { %p537_p8 = pneg %p536_p0 }
  0x77   : > { %750 = dma.done.wait (%p537_p8), %s367_s5, 128  }
  0x78   : > { %752 = vsyncadd (%p537_p8), %s367_s5, 4294967168  ;;  %s1021_s18 = sld [smem:[#allocation16_spill]]  ;;  %s1024_s15 = smov %s759_s16 }
  0x79   : > { %s1022_s14 = sld [smem:[#allocation15_spill]] }
  0x7a   : > { %s1023_s17 = sld [smem:[#allocation17_spill]] }
  0x7e   : > { %p23_p10 = scmp.ge.s32.totalorder %s1021_s18, 4  }
  0x7f   : > { %s1025_s16 = smov %s1022_s14 }
  0x80   :  { %25 = sbr.rel (!%p23_p10) target bundleno = 11 (0xb), region = 118 }
  0x85   :  { %373 = vsyncpa [#allocation3], 1 }
  0x86   :  { %375 = vsyncpa [#allocation3 + $0x1], 1 }
  0x87   :  { %376 = vsyncpa [#allocation6], 1 }
  0x88   :  { %378 = vsyncpa [#allocation6 + $0x1], 1 }
  0x89   :  { %379 = vsyncpa [#allocation9], 1 }
  0x8a   :  { %381 = vsyncpa [#allocation9 + $0x1], 1 }
  0x8b   :  { %382 = vsyncpa [#allocation4], 1 }
  0x8c   :  { %384 = vsyncpa [#allocation4 + $0x1], 1 }

</bundles_post_ra>
